<compile_context>
chip_gen: v6e
topology: v6e:2x2x1
jax: 0.10.0
libtpu: 0.0.40
codegen_flags: <defaults>
</compile_context>

<pallas_src>
from functools import partial

import jax
import jax.numpy as jnp
from jax.experimental import pallas as pl
from jax.experimental.pallas import tpu as pltpu


# ----------------------------------------------------------------------------
# Fused LSTM + final Linear kernel (single grid point, everything VMEM resident)
# ----------------------------------------------------------------------------
def _rnn1_kernel(x_ref, h0_ref, c0_ref, w_ih_ref, w_hh_ref, b_ref,
                 lw_ref, lb_ref, out_ref, xp_ref, *, seq_len, hidden, batch):
    H = hidden
    H3 = 3 * H
    w_hh = w_hh_ref[...]                                          # (H, 4H), gates [i,f,o,g]

    # Input projections for ALL timesteps in one lane-dense MXU matmul, staged in VMEM:
    # x is time-major (T*B_pad, C); row (t*B_pad + b).
    xp_ref[...] = (jnp.dot(x_ref[...], w_ih_ref[...],
                           preferred_element_type=jnp.float32) + b_ref[...])  # (T*B_pad, 4H)

    h = h0_ref[...]                                               # (B_pad, H)
    c = c0_ref[...]                                               # (B_pad, H)

    # T is small & static -> fully unrolled recurrence, activations stay in vregs.
    for t in range(seq_len):
        x_t = xp_ref[t * batch:(t + 1) * batch, :]                # aligned (8, 128) tile
        gates = x_t + jnp.dot(h, w_hh, preferred_element_type=jnp.float32)   # (B_pad, 4H)
        # Gate order [i, f, o, g]: one sigmoid over 3H lanes (single tanh), one tanh over H.
        ifo = 0.5 * (jnp.tanh(0.5 * gates[:, :H3]) + 1.0)         # sigmoid(i,f,o)
        g_g = jnp.tanh(gates[:, H3:])
        i_g = ifo[:, 0 * H:1 * H]
        f_g = ifo[:, 1 * H:2 * H]
        o_g = ifo[:, 2 * H:3 * H]
        c = f_g * c + i_g * g_g
        h = o_g * jnp.tanh(c)

    # Final Linear(H, 1): VPU multiply + lane reduce (no transpose, no N=1 matmul),
    # broadcast to a lane-dense (B_pad, 128) slab so the store is an unmasked vst.
    out = jnp.sum(h * lw_ref[...], axis=1, keepdims=True) + lb_ref[...]      # (B_pad, 1)
    out_ref[...] = jnp.broadcast_to(out, out_ref.shape).astype(out_ref.dtype)


def rnn1_forward(prep, x, h0, c0):
    """x: (B, T, C) batch_first; h0, c0: (B, H). Returns (B, 1)."""
    B, T, C = x.shape
    H = h0.shape[-1]
    H4 = 4 * H
    B_pad = max(8, ((B + 7) // 8) * 8)   # pad batch to a full sublane group

    # Zero-pad batch and build a time-major (T*B_pad, C) slab (trace-time layout prep).
    x_p = jnp.zeros((B_pad, T, C), x.dtype).at[:B].set(x)
    h0_p = jnp.zeros((B_pad, H), h0.dtype).at[:B].set(h0)
    c0_p = jnp.zeros((B_pad, H), c0.dtype).at[:B].set(c0)
    x_tb = jnp.transpose(x_p, (1, 0, 2)).reshape(T * B_pad, C)

    kernel = partial(_rnn1_kernel, seq_len=T, hidden=H, batch=B_pad)
    out_full = pl.pallas_call(
        kernel,
        out_shape=jax.ShapeDtypeStruct((B_pad, 128), jnp.float32),
        in_specs=[
            pl.BlockSpec((T * B_pad, C), lambda: (0, 0)),  # x (time-major, batch-padded)
            pl.BlockSpec((B_pad, H), lambda: (0, 0)),      # h0
            pl.BlockSpec((B_pad, H), lambda: (0, 0)),      # c0
            pl.BlockSpec((C, H4), lambda: (0, 0)),         # w_ih (pre-transposed, [i,f,o,g])
            pl.BlockSpec((H, H4), lambda: (0, 0)),         # w_hh (pre-transposed, [i,f,o,g])
            pl.BlockSpec((1, H4), lambda: (0, 0)),         # folded LSTM bias ([i,f,o,g])
            pl.BlockSpec((1, H), lambda: (0, 0)),          # lin weight (PyTorch (1, H) layout)
            pl.BlockSpec((1, 1), lambda: (0, 0)),          # lin bias
        ],
        out_specs=pl.BlockSpec((B_pad, 128), lambda: (0, 0)),
        scratch_shapes=[pltpu.VMEM((T * B_pad, H4), jnp.float32)],   # staged x_proj
    )(x_tb, h0_p, c0_p, prep["w_ih_t"], prep["w_hh_t"], prep["b"],
      prep["lin_w"], prep["lin_b"])

    return out_full[:B, :1]


# ----------------------------------------------------------------------------
# Parameters (PyTorch-style init) + one-time layout preparation
# ----------------------------------------------------------------------------
def init_params(key, n_inputs, hidden):
    bound = 1.0 / (hidden ** 0.5)
    ks = jax.random.split(key, 6)
    u = lambda k, shape: jax.random.uniform(k, shape, jnp.float32, -bound, bound)
    return {
        "w_ih": u(ks[0], (4 * hidden, n_inputs)),   # LSTM weight_ih_l0 (gates i,f,g,o)
        "w_hh": u(ks[1], (4 * hidden, hidden)),     # LSTM weight_hh_l0
        "b_ih": u(ks[2], (4 * hidden,)),
        "b_hh": u(ks[3], (4 * hidden,)),
        "lin_w": u(ks[4], (1, hidden)),             # Linear(h, 1).weight
        "lin_b": u(ks[5], (1,)),
    }


def _reorder_gate_cols(w):
    """Columns are 4H wide in PyTorch gate order [i, f, g, o]; permute to [i, f, o, g]."""
    i, f, g, o = jnp.split(w, 4, axis=1)
    return jnp.concatenate([i, f, o, g], axis=1)


def prepare_params(params):
    """One-time prep: pre-transpose LSTM weights, fold the two biases, and permute
    the gate blocks to [i, f, o, g] (weights AND bias permuted identically)."""
    return {
        "w_ih_t": _reorder_gate_cols(jnp.transpose(params["w_ih"])),              # (C, 4H)
        "w_hh_t": _reorder_gate_cols(jnp.transpose(params["w_hh"])),              # (H, 4H)
        "b": _reorder_gate_cols((params["b_ih"] + params["b_hh"]).reshape(1, -1)),  # (1, 4H)
        "lin_w": params["lin_w"],                                                 # (1, H)
        "lin_b": params["lin_b"].reshape(1, 1),                                   # (1, 1)
    }


# ----------------------------------------------------------------------------
# Pure-JAX reference for correctness (PyTorch gate order, unpermuted weights)
# ----------------------------------------------------------------------------
def rnn1_reference(params, x, h0, c0):
    B, T, C = x.shape
    H = h0.shape[-1]
    w_ih_t = params["w_ih"].T
    w_hh_t = params["w_hh"].T
    b = params["b_ih"] + params["b_hh"]
    h, c = h0, c0
    for t in range(T):
        g = x[:, t, :] @ w_ih_t + h @ w_hh_t + b
        i = jax.nn.sigmoid(g[:, :H])
        f = jax.nn.sigmoid(g[:, H:2 * H])
        gg = jnp.tanh(g[:, 2 * H:3 * H])
        o = jax.nn.sigmoid(g[:, 3 * H:])
        c = f * c + i * gg
        h = o * jnp.tanh(c)
    return h @ params["lin_w"].T + params["lin_b"]


if __name__ == "__main__":
    # cfg: batch_size=2, n_inputs=4, rnn=[seq, hidden]=[8, 32]
    B, T, C, H = 2, 8, 4, 32
    key = jax.random.PRNGKey(0)
    k_x, k_h, k_c, k_p = jax.random.split(key, 4)

    x = jax.random.normal(k_x, (B, T, C), dtype=jnp.float32)
    # forward(hidden=None) draws random-normal (h0, c0): init_tensor(1, 1, B, H)
    h0 = jax.random.normal(k_h, (1, B, H), dtype=jnp.float32)[0]
    c0 = jax.random.normal(k_c, (1, B, H), dtype=jnp.float32)[0]

    params = init_params(k_p, C, H)
    prep = prepare_params(params)

    fwd = jax.jit(rnn1_forward)
    out = jax.block_until_ready(fwd(prep, x, h0, c0))
    assert out.shape == (B, 1), out.shape

    ref = rnn1_reference(params, x, h0, c0)
    assert bool(jnp.allclose(out, ref, atol=2e-3, rtol=2e-3)), (out, ref)

    # TODO(synk): dropout (LSTM inter-layer + post-ReLU) is identity here: the LSTM has
    # a single layer and the linear-layer loop breaks before any dropout is applied.
    print("KERNEL_OK")
</pallas_src>

<mosaic_0001>
module attributes {stable_mosaic.version = 11 : i64} {
  func.func @_rnn1_kernel(%arg0: memref<64x4xf32, #tpu.memory_space<vmem>>, %arg1: memref<8x32xf32, #tpu.memory_space<vmem>>, %arg2: memref<8x32xf32, #tpu.memory_space<vmem>>, %arg3: memref<4x128xf32, #tpu.memory_space<vmem>>, %arg4: memref<32x128xf32, #tpu.memory_space<vmem>>, %arg5: memref<1x128xf32, #tpu.memory_space<vmem>>, %arg6: memref<1x32xf32, #tpu.memory_space<vmem>>, %arg7: memref<1x1xf32, #tpu.memory_space<vmem>>, %arg8: memref<8x128xf32, #tpu.memory_space<vmem>>, %arg9: memref<64x128xf32, #tpu.memory_space<vmem>>) attributes {dimension_semantics = [], scalar_prefetch = 0 : i64, scratch_operands = 1 : i64, tpu.core_type = #tpu.core_type<tc>} {
    %c0 = arith.constant 0 : index
    %c0_0 = arith.constant 0 : index
    %0 = vector.load %arg4[%c0, %c0_0] : memref<32x128xf32, #tpu.memory_space<vmem>>, vector<32x128xf32>
    %c0_1 = arith.constant 0 : index
    %c0_2 = arith.constant 0 : index
    %1 = vector.load %arg0[%c0_1, %c0_2] : memref<64x4xf32, #tpu.memory_space<vmem>>, vector<64x4xf32>
    %c0_3 = arith.constant 0 : index
    %c0_4 = arith.constant 0 : index
    %2 = vector.load %arg3[%c0_3, %c0_4] : memref<4x128xf32, #tpu.memory_space<vmem>>, vector<4x128xf32>
    %cst = arith.constant dense<0.000000e+00> : vector<64x128xf32>
    %3 = tpu.matmul %1, %2, %cst {dimension_numbers = #tpu.dot_dimension_numbers<[1], [0], [0], [1], [0, 0, 1, 1], [], []>} : vector<64x4xf32>, vector<4x128xf32>, vector<64x128xf32> -> vector<64x128xf32>
    %c0_5 = arith.constant 0 : index
    %c0_6 = arith.constant 0 : index
    %4 = vector.load %arg5[%c0_5, %c0_6] : memref<1x128xf32, #tpu.memory_space<vmem>>, vector<1x128xf32>
    %5 = vector.broadcast %4 : vector<1x128xf32> to vector<64x128xf32>
    %6 = arith.addf %3, %5 : vector<64x128xf32>
    %c0_7 = arith.constant 0 : index
    %c0_8 = arith.constant 0 : index
    %7 = vector.load %arg9[%c0_7, %c0_8] : memref<64x128xf32, #tpu.memory_space<vmem>>, vector<64x128xf32>
    tpu.vector_store %arg9[%c0_7, %c0_8], %6 {strides = array<i32>} : memref<64x128xf32, #tpu.memory_space<vmem>>, vector<64x128xf32>,
    %c0_9 = arith.constant 0 : index
    %c0_10 = arith.constant 0 : index
    %8 = vector.load %arg1[%c0_9, %c0_10] : memref<8x32xf32, #tpu.memory_space<vmem>>, vector<8x32xf32>
    %c0_11 = arith.constant 0 : index
    %c0_12 = arith.constant 0 : index
    %9 = vector.load %arg2[%c0_11, %c0_12] : memref<8x32xf32, #tpu.memory_space<vmem>>, vector<8x32xf32>
    %c0_13 = arith.constant 0 : index
    %c0_14 = arith.constant 0 : index
    %10 = vector.load %arg9[%c0_13, %c0_14] : memref<64x128xf32, #tpu.memory_space<vmem>>, vector<8x128xf32>
    %cst_15 = arith.constant dense<0.000000e+00> : vector<8x128xf32>
    %11 = tpu.matmul %8, %0, %cst_15 {dimension_numbers = #tpu.dot_dimension_numbers<[1], [0], [0], [1], [0, 0, 1, 1], [], []>} : vector<8x32xf32>, vector<32x128xf32>, vector<8x128xf32> -> vector<8x128xf32>
    %12 = arith.addf %10, %11 : vector<8x128xf32>
    %13 = vector.extract_strided_slice %12 {offsets = [0, 0], sizes = [8, 96], strides = [1, 1]} : vector<8x128xf32> to vector<8x96xf32>
    %cst_16 = arith.constant 5.000000e-01 : f32
    %14 = vector.broadcast %cst_16 : f32 to vector<8x96xf32>
    %15 = arith.mulf %14, %13 : vector<8x96xf32>
    %16 = math.tanh %15 : vector<8x96xf32>
    %cst_17 = arith.constant 1.000000e+00 : f32
    %17 = vector.broadcast %cst_17 : f32 to vector<8x96xf32>
    %18 = arith.addf %16, %17 : vector<8x96xf32>
    %cst_18 = arith.constant 5.000000e-01 : f32
    %19 = vector.broadcast %cst_18 : f32 to vector<8x96xf32>
    %20 = arith.mulf %19, %18 : vector<8x96xf32>
    %21 = vector.extract_strided_slice %12 {offsets = [0, 96], sizes = [8, 32], strides = [1, 1]} : vector<8x128xf32> to vector<8x32xf32>
    %22 = math.tanh %21 : vector<8x32xf32>
    %23 = vector.extract_strided_slice %20 {offsets = [0, 0], sizes = [8, 32], strides = [1, 1]} : vector<8x96xf32> to vector<8x32xf32>
    %24 = vector.extract_strided_slice %20 {offsets = [0, 32], sizes = [8, 32], strides = [1, 1]} : vector<8x96xf32> to vector<8x32xf32>
    %25 = vector.extract_strided_slice %20 {offsets = [0, 64], sizes = [8, 32], strides = [1, 1]} : vector<8x96xf32> to vector<8x32xf32>
    %26 = arith.mulf %24, %9 : vector<8x32xf32>
    %27 = arith.mulf %23, %22 : vector<8x32xf32>
    %28 = arith.addf %26, %27 : vector<8x32xf32>
    %29 = math.tanh %28 : vector<8x32xf32>
    %30 = arith.mulf %25, %29 : vector<8x32xf32>
    %c8 = arith.constant 8 : index
    %c0_19 = arith.constant 0 : index
    %31 = vector.load %arg9[%c8, %c0_19] : memref<64x128xf32, #tpu.memory_space<vmem>>, vector<8x128xf32>
    %cst_20 = arith.constant dense<0.000000e+00> : vector<8x128xf32>
    %32 = tpu.matmul %30, %0, %cst_20 {dimension_numbers = #tpu.dot_dimension_numbers<[1], [0], [0], [1], [0, 0, 1, 1], [], []>} : vector<8x32xf32>, vector<32x128xf32>, vector<8x128xf32> -> vector<8x128xf32>
    %33 = arith.addf %31, %32 : vector<8x128xf32>
    %34 = vector.extract_strided_slice %33 {offsets = [0, 0], sizes = [8, 96], strides = [1, 1]} : vector<8x128xf32> to vector<8x96xf32>
    %cst_21 = arith.constant 5.000000e-01 : f32
    %35 = vector.broadcast %cst_21 : f32 to vector<8x96xf32>
    %36 = arith.mulf %35, %34 : vector<8x96xf32>
    %37 = math.tanh %36 : vector<8x96xf32>
    %cst_22 = arith.constant 1.000000e+00 : f32
    %38 = vector.broadcast %cst_22 : f32 to vector<8x96xf32>
    %39 = arith.addf %37, %38 : vector<8x96xf32>
    %cst_23 = arith.constant 5.000000e-01 : f32
    %40 = vector.broadcast %cst_23 : f32 to vector<8x96xf32>
    %41 = arith.mulf %40, %39 : vector<8x96xf32>
    %42 = vector.extract_strided_slice %33 {offsets = [0, 96], sizes = [8, 32], strides = [1, 1]} : vector<8x128xf32> to vector<8x32xf32>
    %43 = math.tanh %42 : vector<8x32xf32>
    %44 = vector.extract_strided_slice %41 {offsets = [0, 0], sizes = [8, 32], strides = [1, 1]} : vector<8x96xf32> to vector<8x32xf32>
    %45 = vector.extract_strided_slice %41 {offsets = [0, 32], sizes = [8, 32], strides = [1, 1]} : vector<8x96xf32> to vector<8x32xf32>
    %46 = vector.extract_strided_slice %41 {offsets = [0, 64], sizes = [8, 32], strides = [1, 1]} : vector<8x96xf32> to vector<8x32xf32>
    %47 = arith.mulf %45, %28 : vector<8x32xf32>
    %48 = arith.mulf %44, %43 : vector<8x32xf32>
    %49 = arith.addf %47, %48 : vector<8x32xf32>
    %50 = math.tanh %49 : vector<8x32xf32>
    %51 = arith.mulf %46, %50 : vector<8x32xf32>
    %c16 = arith.constant 16 : index
    %c0_24 = arith.constant 0 : index
    %52 = vector.load %arg9[%c16, %c0_24] : memref<64x128xf32, #tpu.memory_space<vmem>>, vector<8x128xf32>
    %cst_25 = arith.constant dense<0.000000e+00> : vector<8x128xf32>
    %53 = tpu.matmul %51, %0, %cst_25 {dimension_numbers = #tpu.dot_dimension_numbers<[1], [0], [0], [1], [0, 0, 1, 1], [], []>} : vector<8x32xf32>, vector<32x128xf32>, vector<8x128xf32> -> vector<8x128xf32>
    %54 = arith.addf %52, %53 : vector<8x128xf32>
    %55 = vector.extract_strided_slice %54 {offsets = [0, 0], sizes = [8, 96], strides = [1, 1]} : vector<8x128xf32> to vector<8x96xf32>
    %cst_26 = arith.constant 5.000000e-01 : f32
    %56 = vector.broadcast %cst_26 : f32 to vector<8x96xf32>
    %57 = arith.mulf %56, %55 : vector<8x96xf32>
    %58 = math.tanh %57 : vector<8x96xf32>
    %cst_27 = arith.constant 1.000000e+00 : f32
    %59 = vector.broadcast %cst_27 : f32 to vector<8x96xf32>
    %60 = arith.addf %58, %59 : vector<8x96xf32>
    %cst_28 = arith.constant 5.000000e-01 : f32
    %61 = vector.broadcast %cst_28 : f32 to vector<8x96xf32>
    %62 = arith.mulf %61, %60 : vector<8x96xf32>
    %63 = vector.extract_strided_slice %54 {offsets = [0, 96], sizes = [8, 32], strides = [1, 1]} : vector<8x128xf32> to vector<8x32xf32>
    %64 = math.tanh %63 : vector<8x32xf32>
    %65 = vector.extract_strided_slice %62 {offsets = [0, 0], sizes = [8, 32], strides = [1, 1]} : vector<8x96xf32> to vector<8x32xf32>
    %66 = vector.extract_strided_slice %62 {offsets = [0, 32], sizes = [8, 32], strides = [1, 1]} : vector<8x96xf32> to vector<8x32xf32>
    %67 = vector.extract_strided_slice %62 {offsets = [0, 64], sizes = [8, 32], strides = [1, 1]} : vector<8x96xf32> to vector<8x32xf32>
    %68 = arith.mulf %66, %49 : vector<8x32xf32>
    %69 = arith.mulf %65, %64 : vector<8x32xf32>
    %70 = arith.addf %68, %69 : vector<8x32xf32>
    %71 = math.tanh %70 : vector<8x32xf32>
    %72 = arith.mulf %67, %71 : vector<8x32xf32>
    %c24 = arith.constant 24 : index
    %c0_29 = arith.constant 0 : index
    %73 = vector.load %arg9[%c24, %c0_29] : memref<64x128xf32, #tpu.memory_space<vmem>>, vector<8x128xf32>
    %cst_30 = arith.constant dense<0.000000e+00> : vector<8x128xf32>
    %74 = tpu.matmul %72, %0, %cst_30 {dimension_numbers = #tpu.dot_dimension_numbers<[1], [0], [0], [1], [0, 0, 1, 1], [], []>} : vector<8x32xf32>, vector<32x128xf32>, vector<8x128xf32> -> vector<8x128xf32>
    %75 = arith.addf %73, %74 : vector<8x128xf32>
    %76 = vector.extract_strided_slice %75 {offsets = [0, 0], sizes = [8, 96], strides = [1, 1]} : vector<8x128xf32> to vector<8x96xf32>
    %cst_31 = arith.constant 5.000000e-01 : f32
    %77 = vector.broadcast %cst_31 : f32 to vector<8x96xf32>
    %78 = arith.mulf %77, %76 : vector<8x96xf32>
    %79 = math.tanh %78 : vector<8x96xf32>
    %cst_32 = arith.constant 1.000000e+00 : f32
    %80 = vector.broadcast %cst_32 : f32 to vector<8x96xf32>
    %81 = arith.addf %79, %80 : vector<8x96xf32>
    %cst_33 = arith.constant 5.000000e-01 : f32
    %82 = vector.broadcast %cst_33 : f32 to vector<8x96xf32>
    %83 = arith.mulf %82, %81 : vector<8x96xf32>
    %84 = vector.extract_strided_slice %75 {offsets = [0, 96], sizes = [8, 32], strides = [1, 1]} : vector<8x128xf32> to vector<8x32xf32>
    %85 = math.tanh %84 : vector<8x32xf32>
    %86 = vector.extract_strided_slice %83 {offsets = [0, 0], sizes = [8, 32], strides = [1, 1]} : vector<8x96xf32> to vector<8x32xf32>
    %87 = vector.extract_strided_slice %83 {offsets = [0, 32], sizes = [8, 32], strides = [1, 1]} : vector<8x96xf32> to vector<8x32xf32>
    %88 = vector.extract_strided_slice %83 {offsets = [0, 64], sizes = [8, 32], strides = [1, 1]} : vector<8x96xf32> to vector<8x32xf32>
    %89 = arith.mulf %87, %70 : vector<8x32xf32>
    %90 = arith.mulf %86, %85 : vector<8x32xf32>
    %91 = arith.addf %89, %90 : vector<8x32xf32>
    %92 = math.tanh %91 : vector<8x32xf32>
    %93 = arith.mulf %88, %92 : vector<8x32xf32>
    %c32 = arith.constant 32 : index
    %c0_34 = arith.constant 0 : index
    %94 = vector.load %arg9[%c32, %c0_34] : memref<64x128xf32, #tpu.memory_space<vmem>>, vector<8x128xf32>
    %cst_35 = arith.constant dense<0.000000e+00> : vector<8x128xf32>
    %95 = tpu.matmul %93, %0, %cst_35 {dimension_numbers = #tpu.dot_dimension_numbers<[1], [0], [0], [1], [0, 0, 1, 1], [], []>} : vector<8x32xf32>, vector<32x128xf32>, vector<8x128xf32> -> vector<8x128xf32>
    %96 = arith.addf %94, %95 : vector<8x128xf32>
    %97 = vector.extract_strided_slice %96 {offsets = [0, 0], sizes = [8, 96], strides = [1, 1]} : vector<8x128xf32> to vector<8x96xf32>
    %cst_36 = arith.constant 5.000000e-01 : f32
    %98 = vector.broadcast %cst_36 : f32 to vector<8x96xf32>
    %99 = arith.mulf %98, %97 : vector<8x96xf32>
    %100 = math.tanh %99 : vector<8x96xf32>
    %cst_37 = arith.constant 1.000000e+00 : f32
    %101 = vector.broadcast %cst_37 : f32 to vector<8x96xf32>
    %102 = arith.addf %100, %101 : vector<8x96xf32>
    %cst_38 = arith.constant 5.000000e-01 : f32
    %103 = vector.broadcast %cst_38 : f32 to vector<8x96xf32>
    %104 = arith.mulf %103, %102 : vector<8x96xf32>
    %105 = vector.extract_strided_slice %96 {offsets = [0, 96], sizes = [8, 32], strides = [1, 1]} : vector<8x128xf32> to vector<8x32xf32>
    %106 = math.tanh %105 : vector<8x32xf32>
    %107 = vector.extract_strided_slice %104 {offsets = [0, 0], sizes = [8, 32], strides = [1, 1]} : vector<8x96xf32> to vector<8x32xf32>
    %108 = vector.extract_strided_slice %104 {offsets = [0, 32], sizes = [8, 32], strides = [1, 1]} : vector<8x96xf32> to vector<8x32xf32>
    %109 = vector.extract_strided_slice %104 {offsets = [0, 64], sizes = [8, 32], strides = [1, 1]} : vector<8x96xf32> to vector<8x32xf32>
    %110 = arith.mulf %108, %91 : vector<8x32xf32>
    %111 = arith.mulf %107, %106 : vector<8x32xf32>
    %112 = arith.addf %110, %111 : vector<8x32xf32>
    %113 = math.tanh %112 : vector<8x32xf32>
    %114 = arith.mulf %109, %113 : vector<8x32xf32>
    %c40 = arith.constant 40 : index
    %c0_39 = arith.constant 0 : index
    %115 = vector.load %arg9[%c40, %c0_39] : memref<64x128xf32, #tpu.memory_space<vmem>>, vector<8x128xf32>
    %cst_40 = arith.constant dense<0.000000e+00> : vector<8x128xf32>
    %116 = tpu.matmul %114, %0, %cst_40 {dimension_numbers = #tpu.dot_dimension_numbers<[1], [0], [0], [1], [0, 0, 1, 1], [], []>} : vector<8x32xf32>, vector<32x128xf32>, vector<8x128xf32> -> vector<8x128xf32>
    %117 = arith.addf %115, %116 : vector<8x128xf32>
    %118 = vector.extract_strided_slice %117 {offsets = [0, 0], sizes = [8, 96], strides = [1, 1]} : vector<8x128xf32> to vector<8x96xf32>
    %cst_41 = arith.constant 5.000000e-01 : f32
    %119 = vector.broadcast %cst_41 : f32 to vector<8x96xf32>
    %120 = arith.mulf %119, %118 : vector<8x96xf32>
    %121 = math.tanh %120 : vector<8x96xf32>
    %cst_42 = arith.constant 1.000000e+00 : f32
    %122 = vector.broadcast %cst_42 : f32 to vector<8x96xf32>
    %123 = arith.addf %121, %122 : vector<8x96xf32>
    %cst_43 = arith.constant 5.000000e-01 : f32
    %124 = vector.broadcast %cst_43 : f32 to vector<8x96xf32>
    %125 = arith.mulf %124, %123 : vector<8x96xf32>
    %126 = vector.extract_strided_slice %117 {offsets = [0, 96], sizes = [8, 32], strides = [1, 1]} : vector<8x128xf32> to vector<8x32xf32>
    %127 = math.tanh %126 : vector<8x32xf32>
    %128 = vector.extract_strided_slice %125 {offsets = [0, 0], sizes = [8, 32], strides = [1, 1]} : vector<8x96xf32> to vector<8x32xf32>
    %129 = vector.extract_strided_slice %125 {offsets = [0, 32], sizes = [8, 32], strides = [1, 1]} : vector<8x96xf32> to vector<8x32xf32>
    %130 = vector.extract_strided_slice %125 {offsets = [0, 64], sizes = [8, 32], strides = [1, 1]} : vector<8x96xf32> to vector<8x32xf32>
    %131 = arith.mulf %129, %112 : vector<8x32xf32>
    %132 = arith.mulf %128, %127 : vector<8x32xf32>
    %133 = arith.addf %131, %132 : vector<8x32xf32>
    %134 = math.tanh %133 : vector<8x32xf32>
    %135 = arith.mulf %130, %134 : vector<8x32xf32>
    %c48 = arith.constant 48 : index
    %c0_44 = arith.constant 0 : index
    %136 = vector.load %arg9[%c48, %c0_44] : memref<64x128xf32, #tpu.memory_space<vmem>>, vector<8x128xf32>
    %cst_45 = arith.constant dense<0.000000e+00> : vector<8x128xf32>
    %137 = tpu.matmul %135, %0, %cst_45 {dimension_numbers = #tpu.dot_dimension_numbers<[1], [0], [0], [1], [0, 0, 1, 1], [], []>} : vector<8x32xf32>, vector<32x128xf32>, vector<8x128xf32> -> vector<8x128xf32>
    %138 = arith.addf %136, %137 : vector<8x128xf32>
    %139 = vector.extract_strided_slice %138 {offsets = [0, 0], sizes = [8, 96], strides = [1, 1]} : vector<8x128xf32> to vector<8x96xf32>
    %cst_46 = arith.constant 5.000000e-01 : f32
    %140 = vector.broadcast %cst_46 : f32 to vector<8x96xf32>
    %141 = arith.mulf %140, %139 : vector<8x96xf32>
    %142 = math.tanh %141 : vector<8x96xf32>
    %cst_47 = arith.constant 1.000000e+00 : f32
    %143 = vector.broadcast %cst_47 : f32 to vector<8x96xf32>
    %144 = arith.addf %142, %143 : vector<8x96xf32>
    %cst_48 = arith.constant 5.000000e-01 : f32
    %145 = vector.broadcast %cst_48 : f32 to vector<8x96xf32>
    %146 = arith.mulf %145, %144 : vector<8x96xf32>
    %147 = vector.extract_strided_slice %138 {offsets = [0, 96], sizes = [8, 32], strides = [1, 1]} : vector<8x128xf32> to vector<8x32xf32>
    %148 = math.tanh %147 : vector<8x32xf32>
    %149 = vector.extract_strided_slice %146 {offsets = [0, 0], sizes = [8, 32], strides = [1, 1]} : vector<8x96xf32> to vector<8x32xf32>
    %150 = vector.extract_strided_slice %146 {offsets = [0, 32], sizes = [8, 32], strides = [1, 1]} : vector<8x96xf32> to vector<8x32xf32>
    %151 = vector.extract_strided_slice %146 {offsets = [0, 64], sizes = [8, 32], strides = [1, 1]} : vector<8x96xf32> to vector<8x32xf32>
    %152 = arith.mulf %150, %133 : vector<8x32xf32>
    %153 = arith.mulf %149, %148 : vector<8x32xf32>
    %154 = arith.addf %152, %153 : vector<8x32xf32>
    %155 = math.tanh %154 : vector<8x32xf32>
    %156 = arith.mulf %151, %155 : vector<8x32xf32>
    %c56 = arith.constant 56 : index
    %c0_49 = arith.constant 0 : index
    %157 = vector.load %arg9[%c56, %c0_49] : memref<64x128xf32, #tpu.memory_space<vmem>>, vector<8x128xf32>
    %cst_50 = arith.constant dense<0.000000e+00> : vector<8x128xf32>
    %158 = tpu.matmul %156, %0, %cst_50 {dimension_numbers = #tpu.dot_dimension_numbers<[1], [0], [0], [1], [0, 0, 1, 1], [], []>} : vector<8x32xf32>, vector<32x128xf32>, vector<8x128xf32> -> vector<8x128xf32>
    %159 = arith.addf %157, %158 : vector<8x128xf32>
    %160 = vector.extract_strided_slice %159 {offsets = [0, 0], sizes = [8, 96], strides = [1, 1]} : vector<8x128xf32> to vector<8x96xf32>
    %cst_51 = arith.constant 5.000000e-01 : f32
    %161 = vector.broadcast %cst_51 : f32 to vector<8x96xf32>
    %162 = arith.mulf %161, %160 : vector<8x96xf32>
    %163 = math.tanh %162 : vector<8x96xf32>
    %cst_52 = arith.constant 1.000000e+00 : f32
    %164 = vector.broadcast %cst_52 : f32 to vector<8x96xf32>
    %165 = arith.addf %163, %164 : vector<8x96xf32>
    %cst_53 = arith.constant 5.000000e-01 : f32
    %166 = vector.broadcast %cst_53 : f32 to vector<8x96xf32>
    %167 = arith.mulf %166, %165 : vector<8x96xf32>
    %168 = vector.extract_strided_slice %159 {offsets = [0, 96], sizes = [8, 32], strides = [1, 1]} : vector<8x128xf32> to vector<8x32xf32>
    %169 = math.tanh %168 : vector<8x32xf32>
    %170 = vector.extract_strided_slice %167 {offsets = [0, 0], sizes = [8, 32], strides = [1, 1]} : vector<8x96xf32> to vector<8x32xf32>
    %171 = vector.extract_strided_slice %167 {offsets = [0, 32], sizes = [8, 32], strides = [1, 1]} : vector<8x96xf32> to vector<8x32xf32>
    %172 = vector.extract_strided_slice %167 {offsets = [0, 64], sizes = [8, 32], strides = [1, 1]} : vector<8x96xf32> to vector<8x32xf32>
    %173 = arith.mulf %171, %154 : vector<8x32xf32>
    %174 = arith.mulf %170, %169 : vector<8x32xf32>
    %175 = arith.addf %173, %174 : vector<8x32xf32>
    %176 = math.tanh %175 : vector<8x32xf32>
    %177 = arith.mulf %172, %176 : vector<8x32xf32>
    %c0_54 = arith.constant 0 : index
    %c0_55 = arith.constant 0 : index
    %178 = vector.load %arg6[%c0_54, %c0_55] : memref<1x32xf32, #tpu.memory_space<vmem>>, vector<1x32xf32>
    %179 = vector.broadcast %178 : vector<1x32xf32> to vector<8x32xf32>
    %180 = arith.mulf %177, %179 : vector<8x32xf32>
    %cst_56 = arith.constant dense<0.000000e+00> : vector<8xf32>
    %181 = vector.multi_reduction <add>, %180, %cst_56 [1] : vector<8x32xf32> to vector<8xf32>
    %182 = vector.shape_cast %181 : vector<8xf32> to vector<8x1xf32>
    %c0_57 = arith.constant 0 : index
    %c0_58 = arith.constant 0 : index
    %183 = vector.load %arg7[%c0_57, %c0_58] : memref<1x1xf32, #tpu.memory_space<vmem>>, vector<1x1xf32>
    %184 = vector.broadcast %183 : vector<1x1xf32> to vector<8x1xf32>
    %185 = arith.addf %182, %184 : vector<8x1xf32>
    %186 = vector.shape_cast %185 : vector<8x1xf32> to vector<8x1xf32>
    %187 = vector.broadcast %186 : vector<8x1xf32> to vector<8x128xf32>
    %c0_59 = arith.constant 0 : index
    %c0_60 = arith.constant 0 : index
    %188 = vector.load %arg8[%c0_59, %c0_60] : memref<8x128xf32, #tpu.memory_space<vmem>>, vector<8x128xf32>
    tpu.vector_store %arg8[%c0_59, %c0_60], %187 {strides = array<i32>} : memref<8x128xf32, #tpu.memory_space<vmem>>, vector<8x128xf32>,
    return
  }
}

</mosaic_0001>

<bundles_post_ra>
// kernel: rnn1_forward.1
= control target key start
LH: loop header
LB: loop body
LE: loop exit
PB: predicated region body
PF: predicated region fallthrough
CT: control target
= control target key end

     0   :  { %vm76_vm0 = vcmask 1043456   ;;  %vm51_vm1 = vcmask 31744   ;;  %v1251_v0 = vmov 0.0   ;;  %vm1252_vm2 = vmmov 0   ;;  %s1253_s20 = smov 32   ;;  %s1519_s3 = inlined_call_operand.vmem [shape: f32[4,128], index: 3, kind: input, shape index: {}]   ;;  %s1520_s4 = inlined_call_operand.vmem [shape: f32[32,128], index: 4, kind: input, shape index: {}]   ;;  %s1521_s0 = inlined_call_operand.vmem [shape: f32[64,4], index: 0, kind: input, shape index: {}]   ;;  %s1522_s1 = inlined_call_operand.vmem [shape: f32[8,32], index: 1, kind: input, shape index: {}]   ;;  %s1523_s5 = inlined_call_operand.vmem [shape: f32[1,128], index: 5, kind: input, shape index: {}]   ;;  %s1524_s2 = inlined_call_operand.vmem [shape: f32[8,32], index: 2, kind: input, shape index: {}]   ;;  %s1525_s6 = inlined_call_operand.vmem [shape: f32[1,32], index: 6, kind: input, shape index: {}]   ;;  %s1526_s7 = inlined_call_operand.<no memory space> [shape: f32[1,1], index: 7, kind: input, shape index: {}]   ;;  %s1527_s8 = inlined_call_operand.vmem [shape: f32[8,128], index: 8, kind: output, shape index: {}]  }
   0x1   :  { %1108 = vmatprep.subr.mxu1 %v1251_v0  ;;  %v43_v1 = vld [vmem:[%s1519_s3] sm:$0xf]  ;;  %v1308_v2 = vld [vmem:[%s1520_s4 + $0x18] sm:$0xff]  ;;  %1116 = vmatprep.mubr.msk.f32.mxu1 %vm1252_vm2, %v1251_v0  ;;  %v36_v4 = vld [vmem:[%s1521_s0 + $0x8] sm:$0xff]  ;;  %vm196_vm3 = vcmask 261120  }
   0x2   :  { %v35_v3 = vld [vmem:[%s1521_s0] sm:$0xff]  ;;  %1094 = vmatprep.subr.msk.mxu0 %vm76_vm0, %v43_v1  ;;  %1109 = vmatpush3.msra.mxu1 %v1308_v2  ;;  %v1322_v5 = vld [vmem:[%s1520_s4 + $0x10] sm:$0xff]  ;;  %v1330_v6 = vld [vmem:[%s1520_s4 + $0x8] sm:$0xff] }
   0x3   :  { %1095 = vmatpush3.msk.msra.mxu0 %vm76_vm0, %v43_v1  ;;  %1096 = vmatprep.mubr.msk.f32.mxu0 %vm51_vm1, %v35_v3  ;;  %v1338_v7 = vld [vmem:[%s1520_s4] sm:$0xff]  ;;  %v37_v46 = vld [vmem:[%s1521_s0 + $0x10] sm:$0xff]  ;;  %v38_v47 = vld [vmem:[%s1521_s0 + $0x18] sm:$0xff] }
   0x4   :  { %1110 = vmatprep.subr.mxu1 %v1251_v0  ;;  %1097 = vmatmul.mubr.msk.f32.vlgmr.msra.gmra.mxu0 %vm51_vm1, %v36_v4  ;;  %v193_v8 = vld [vmem:[%s1522_s1] sm:$0xff]  ;;  %v40_v49 = vld [vmem:[%s1521_s0 + $0x28] sm:$0xff]  ;;  %v41_v50 = vld [vmem:[%s1521_s0 + $0x30] sm:$0xff] }
   0x5   :  { %1111 = vmatpush3.msra.mxu1 %v1322_v5  ;;  %1130 = vmatprep.subr.mxu0 %v1251_v0  ;;  %v1369_v10 = vld [vmem:[%s1523_s5] ss:$0 sm:$0xff]  ;;  %v42_v51 = vld [vmem:[%s1521_s0 + $0x38] sm:$0xff] }
   0x6   :  { %1112 = vmatprep.subr.mxu1 %v1251_v0  ;;  %1131 = vmatpush3.msra.mxu0 %v1308_v2  ;;  %v194_v17 = vld [vmem:[%s1524_s2] sm:$0xff]  ;;  %s1254_s2 = smov 64  }
   0x7   :  { %1113 = vmatpush3.msra.mxu1 %v1330_v6  ;;  %1132 = vmatprep.subr.mxu0 %v1251_v0  ;;  %v39_v48 = vld [vmem:[%s1521_s0 + $0x20] sm:$0xff] }
   0x8   :  { %1114 = vmatprep.subr.mxu1 %v1251_v0  ;;  %1133 = vmatpush3.msra.mxu0 %v1322_v5 }
   0x9   :  { %1115 = vmatpush3.msra.mxu1 %v1338_v7  ;;  %1134 = vmatprep.subr.mxu0 %v1251_v0 }
   0xa   :  { %1117 = vmatmul.mubr.msk.f32.vlgmr.msra.gmra.mxu1 %vm196_vm3, %v193_v8  ;;  %1119 = vmatprep.subr.mxu1 %v1251_v0 }
   0xb   :  { %1120 = vmatpush3.msra.mxu1 %v1308_v2  ;;  %1127 = vmatprep.mubr.msk.f32.mxu1 %vm1252_vm2, %v1251_v0 }
   0xc   :  { %1121 = vmatprep.subr.mxu1 %v1251_v0  ;;  %1135 = vmatpush3.msra.mxu0 %v1330_v6 }
   0xd   :  { %1122 = vmatpush3.msra.mxu1 %v1322_v5  ;;  %1136 = vmatprep.subr.mxu0 %v1251_v0 }
   0xe   :  { %1123 = vmatprep.subr.mxu1 %v1251_v0  ;;  %1137 = vmatpush3.msra.mxu0 %v1338_v7 }
   0xf   :  { %1124 = vmatpush3.msra.mxu1 %v1330_v6  ;;  %1152 = vmatprep.subr.mxu0 %v1251_v0 }
  0x10   :  { %1125 = vmatprep.subr.mxu1 %v1251_v0  ;;  %1099 = vmatprep.mubr.msk.f32.mxu0 %vm51_vm1, %v37_v46 }
  0x11   :  { %1126 = vmatpush3.msra.mxu1 %v1338_v7  ;;  %1100 = vmatmul.mubr.msk.f32.gmra.mxu0 %vm51_vm1, %v38_v47 }
  0x12   :  { %1141 = vmatprep.subr.mxu1 %v1251_v0  ;;  %1102 = vmatprep.mubr.msk.f32.mxu0 %vm51_vm1, %v39_v48 }
  0x15   :  { %1103 = vmatmul.mubr.msk.f32.gmra.mxu0 %vm51_vm1, %v40_v49 }
  0x16   :  { %1105 = vmatprep.mubr.msk.f32.mxu0 %vm51_vm1, %v41_v50 }
  0x19   :  { %1106 = vmatmul.mubr.msk.f32.gmra.mxu0 %vm51_vm1, %v42_v51 }
  0x1a   :  { %1138 = vmatprep.mubr.msk.f32.mxu0 %vm1252_vm2, %v1251_v0 }
  0xc4   :  { %v1098_v9 = vpop.f32.mrf.mxu0 }
  0xc5   :  { %v152_v32 = vadd.f32 %v1098_v9, %v1369_v10 }
  0xc6   :  { %v146_v11 = vpop.f32.mrf.mxu0 }
  0xc7   :  { %v147_v12 = vadd.f32 %v1369_v10, %v146_v11 }
  0xca   :  { %v266_v13 = vpop.f32.mrf.mxu1 }
  0xcb   :  { %v270_v14 = vadd.f32 %v266_v13, %v147_v12 }
  0xcc   :  { %v1118_v15 = vpop.f32.mrf.mxu1 }
  0xcd   :  { %1203 = vtanh.f32 %v270_v14  ;;  %v271_v18 = vmul.f32 0.5, %v270_v14 }
  0xcf   :  { %1205 = vtanh.f32 %v271_v18 }
  0xd1   :  { %v1101_v56 = vpop.f32.mrf.mxu0 }
  0xd3   :  { %v156_v57 = vpop.f32.mrf.mxu0 }
  0xd4   :  { %v157_v62 = vadd.f32 %v1369_v10, %v156_v57 }
  0xd5   :  { %v1433_v58 = vpop.f32.mrf.mxu0 }
  0xd7   :  { %v1435_v59 = vpop.f32.mrf.mxu0 }
  0xd9   :  { %v1437_v60 = vpop.f32.mrf.mxu0 }
  0xda   :  { %v1204_v16 = vpop.eup %1203 }
  0xdb   :  { %282 = vrot.lane.b32.xlu0 %v1204_v16, %s1253_s20  ;;  %v1439_v61 = vpop.f32.mrf.mxu0 }
  0xdc   :  { %v1206_v19 = vpop.eup %1205 }
  0xdd   :  { %v273_v20 = vadd.f32 1.0, %v1206_v19 }
  0xdf   :  { %277 = vrot.lane.b32.xlu0 %v194_v17, %s1253_s20  ;;  %v274_v21 = vmul.f32 0.5, %v273_v20 }
 0x14d   :  { %v283_v22 = vpop.permute.xlu0 %282 }
 0x14e   :  { %v285_v23 = vmul.f32 %v283_v22, %v274_v21  ;;  %v162_v22 = vadd.f32 %v1101_v56, %v1369_v10 }
 0x150   :  { %287 = vrot.lane.b32.xlu1 %v285_v23, %s1253_s20 }
 0x151   :  { %v278_v24 = vpop.permute.xlu0 %277 }
 0x152   :  { %v280_v25 = vmul.f32 %v278_v24, %v274_v21 }
 0x1c2   :  { %v288_v26 = vpop.permute.xlu1 %287 }
 0x1c3   :  { %v290_v27 = vadd.f32 %v288_v26, %v280_v25 }
 0x1c5   :  { %1207 = vtanh.f32 %v290_v27 }
 0x1d2   :  { %v1208_v28 = vpop.eup %1207 }
 0x1d3   :  { %293 = vrot.lane.b32.xlu1 %v1208_v28, %s1253_s20 }
 0x245   :  { %v294_v29 = vpop.permute.xlu1 %293 }
 0x246   :  { %v296_v30 = vmul.f32 %v294_v29, %v274_v21 }
 0x248   :  { %299 = vrot.lane.b32.xlu0 %v296_v30, %s1254_s2 }
 0x2ba   :  { %v300_v31 = vpop.permute.xlu0 %299 }
 0x2bb   :  { %1128 = vmatmul.mubr.msk.f32.vlgmr.msra.gmra.mxu1 %vm196_vm3, %v300_v31 }
 0x2bc   :  { %1142 = vmatpush3.msra.mxu1 %v1308_v2  ;;  %1149 = vmatprep.mubr.msk.f32.mxu1 %vm1252_vm2, %v1251_v0 }
 0x2bd   :  { %1143 = vmatprep.subr.mxu1 %v1251_v0 }
 0x2be   :  { %1144 = vmatpush3.msra.mxu1 %v1322_v5 }
 0x2bf   :  { %1145 = vmatprep.subr.mxu1 %v1251_v0 }
 0x2c0   :  { %1146 = vmatpush3.msra.mxu1 %v1330_v6 }
 0x2c1   :  { %1147 = vmatprep.subr.mxu1 %v1251_v0 }
 0x2c2   :  { %1148 = vmatpush3.msra.mxu1 %v1338_v7 }
 0x2c3   :  { %1163 = vmatprep.subr.mxu1 %v1251_v0 }
 0x37b   :  { %v369_v33 = vpop.f32.mrf.mxu1 }
 0x37c   :  { %v373_v34 = vadd.f32 %v369_v33, %v152_v32 }
 0x37d   :  { %v1129_v35 = vpop.f32.mrf.mxu1 }
 0x37e   :  { %1209 = vtanh.f32 %v373_v34  ;;  %v374_v37 = vmul.f32 0.5, %v373_v34 }
 0x380   :  { %1211 = vtanh.f32 %v374_v37 }
 0x38b   :  { %v1210_v36 = vpop.eup %1209 }
 0x38c   :  { %381 = vrot.lane.b32.xlu1 %v1210_v36, %s1253_s20 }
 0x38d   :  { %v1212_v38 = vpop.eup %1211 }
 0x38e   :  { %v376_v39 = vadd.f32 1.0, %v1212_v38 }
 0x390   :  { %v377_v40 = vmul.f32 0.5, %v376_v39 }
 0x392   :  { %v379_v43 = vmul.f32 %v377_v40, %v290_v27 }
 0x3fe   :  { %v382_v41 = vpop.permute.xlu1 %381 }
 0x3ff   :  { %v384_v42 = vmul.f32 %v382_v41, %v377_v40 }
 0x401   :  { %386 = vrot.lane.b32.xlu0 %v384_v42, %s1253_s20 }
 0x473   :  { %v387_v44 = vpop.permute.xlu0 %386 }
 0x474   :  { %v389_v45 = vadd.f32 %v387_v44, %v379_v43 }
 0x476   :  { %1213 = vtanh.f32 %v389_v45 }
 0x483   :  { %v1214_v52 = vpop.eup %1213 }
 0x484   :  { %392 = vrot.lane.b32.xlu1 %v1214_v52, %s1253_s20 }
 0x4f6   :  { %v393_v53 = vpop.permute.xlu1 %392 }
 0x4f7   :  { %v395_v54 = vmul.f32 %v393_v53, %v377_v40  ;;  %v167_v40 = vadd.f32 %v1369_v10, %v1435_v59  ;;  %v172_v59 = vadd.f32 %v1433_v58, %v1369_v10 }
 0x4f9   :  { %398 = vrot.lane.b32.xlu0 %v395_v54, %s1254_s2 }
 0x56b   :  { %v399_v55 = vpop.permute.xlu0 %398 }
 0x56c   :  { %1139 = vmatmul.mubr.msk.f32.vlgmr.msra.gmra.mxu0 %vm196_vm3, %v399_v55 }
 0x56d   :  { %1153 = vmatpush3.msra.mxu0 %v1308_v2  ;;  %1160 = vmatprep.mubr.msk.f32.mxu0 %vm1252_vm2, %v1251_v0 }
 0x56e   :  { %1154 = vmatprep.subr.mxu0 %v1251_v0 }
 0x56f   :  { %1155 = vmatpush3.msra.mxu0 %v1322_v5 }
 0x570   :  { %1156 = vmatprep.subr.mxu0 %v1251_v0 }
 0x571   :  { %1157 = vmatpush3.msra.mxu0 %v1330_v6 }
 0x572   :  { %1158 = vmatprep.subr.mxu0 %v1251_v0 }
 0x573   :  { %1159 = vmatpush3.msra.mxu0 %v1338_v7 }
 0x574   :  { %1174 = vmatprep.subr.mxu0 %v1251_v0 }
 0x62c   :  { %v468_v63 = vpop.f32.mrf.mxu0 }
 0x62d   :  { %v472_v1 = vadd.f32 %v468_v63, %v157_v62 }
 0x62e   :  { %v1140_v3 = vpop.f32.mrf.mxu0 }
 0x62f   :  { %1215 = vtanh.f32 %v472_v1  ;;  %v473_v8 = vmul.f32 0.5, %v472_v1 }
 0x631   :  { %1217 = vtanh.f32 %v473_v8 }
 0x63c   :  { %v1216_v4 = vpop.eup %1215 }
 0x63d   :  { %480 = vrot.lane.b32.xlu1 %v1216_v4, %s1253_s20 }
 0x63e   :  { %v1218_v9 = vpop.eup %1217 }
 0x63f   :  { %v475_v11 = vadd.f32 1.0, %v1218_v9 }
 0x641   :  { %v476_v12 = vmul.f32 0.5, %v475_v11 }
 0x643   :  { %v478_v15 = vmul.f32 %v476_v12, %v389_v45 }
 0x6af   :  { %v481_v13 = vpop.permute.xlu1 %480 }
 0x6b0   :  { %v483_v14 = vmul.f32 %v481_v13, %v476_v12 }
 0x6b2   :  { %485 = vrot.lane.b32.xlu0 %v483_v14, %s1253_s20 }
 0x724   :  { %v486_v16 = vpop.permute.xlu0 %485 }
 0x725   :  { %v488_v17 = vadd.f32 %v486_v16, %v478_v15  ;;  %v177_v15 = vadd.f32 %v1369_v10, %v1439_v61 }
 0x727   :  { %1219 = vtanh.f32 %v488_v17 }
 0x734   :  { %v1220_v18 = vpop.eup %1219 }
 0x735   :  { %491 = vrot.lane.b32.xlu1 %v1220_v18, %s1253_s20 }
 0x7a7   :  { %v492_v19 = vpop.permute.xlu1 %491 }
 0x7a8   :  { %v494_v20 = vmul.f32 %v492_v19, %v476_v12 }
 0x7aa   :  { %497 = vrot.lane.b32.xlu0 %v494_v20, %s1254_s2 }
 0x81c   :  { %v498_v21 = vpop.permute.xlu0 %497 }
 0x81d   :  { %1150 = vmatmul.mubr.msk.f32.vlgmr.msra.gmra.mxu1 %vm196_vm3, %v498_v21 }
 0x81e   :  { %1164 = vmatpush3.msra.mxu1 %v1308_v2  ;;  %1171 = vmatprep.mubr.msk.f32.mxu1 %vm1252_vm2, %v1251_v0 }
 0x81f   :  { %1165 = vmatprep.subr.mxu1 %v1251_v0 }
 0x820   :  { %1166 = vmatpush3.msra.mxu1 %v1322_v5 }
 0x821   :  { %1167 = vmatprep.subr.mxu1 %v1251_v0 }
 0x822   :  { %1168 = vmatpush3.msra.mxu1 %v1330_v6 }
 0x823   :  { %1169 = vmatprep.subr.mxu1 %v1251_v0 }
 0x824   :  { %1170 = vmatpush3.msra.mxu1 %v1338_v7 }
 0x825   :  { %1185 = vmatprep.subr.mxu1 %v1251_v0 }
 0x8dd   :  { %v567_v23 = vpop.f32.mrf.mxu1 }
 0x8de   :  { %v571_v24 = vadd.f32 %v567_v23, %v162_v22 }
 0x8df   :  { %v1151_v25 = vpop.f32.mrf.mxu1 }
 0x8e0   :  { %1221 = vtanh.f32 %v571_v24  ;;  %v572_v27 = vmul.f32 0.5, %v571_v24 }
 0x8e2   :  { %1223 = vtanh.f32 %v572_v27 }
 0x8ed   :  { %v1222_v26 = vpop.eup %1221 }
 0x8ee   :  { %579 = vrot.lane.b32.xlu1 %v1222_v26, %s1253_s20 }
 0x8ef   :  { %v1224_v28 = vpop.eup %1223 }
 0x8f0   :  { %v574_v29 = vadd.f32 1.0, %v1224_v28 }
 0x8f2   :  { %v575_v30 = vmul.f32 0.5, %v574_v29 }
 0x8f4   :  { %v577_v33 = vmul.f32 %v575_v30, %v488_v17 }
 0x960   :  { %v580_v31 = vpop.permute.xlu1 %579 }
 0x961   :  { %v582_v32 = vmul.f32 %v580_v31, %v575_v30 }
 0x963   :  { %584 = vrot.lane.b32.xlu0 %v582_v32, %s1253_s20  ;;  %v182_v32 = vadd.f32 %v1437_v60, %v1369_v10  ;;  %v1043_v10 = vld [vmem:[%s1525_s6] ss:$0 sm:$0xff] }
 0x9d5   :  { %v585_v34 = vpop.permute.xlu0 %584 }
 0x9d6   :  { %v587_v35 = vadd.f32 %v585_v34, %v577_v33 }
 0x9d8   :  { %1225 = vtanh.f32 %v587_v35 }
 0x9e5   :  { %v1226_v36 = vpop.eup %1225 }
 0x9e6   :  { %590 = vrot.lane.b32.xlu1 %v1226_v36, %s1253_s20 }
 0xa58   :  { %v591_v37 = vpop.permute.xlu1 %590 }
 0xa59   :  { %v593_v38 = vmul.f32 %v591_v37, %v575_v30 }
 0xa5b   :  { %596 = vrot.lane.b32.xlu0 %v593_v38, %s1254_s2 }
 0xacd   :  { %v597_v39 = vpop.permute.xlu0 %596 }
 0xace   :  { %1161 = vmatmul.mubr.msk.f32.vlgmr.msra.gmra.mxu0 %vm196_vm3, %v597_v39 }
 0xacf   :  { %1175 = vmatpush3.msra.mxu0 %v1308_v2  ;;  %1182 = vmatprep.mubr.msk.f32.mxu0 %vm1252_vm2, %v1251_v0 }
 0xad0   :  { %1176 = vmatprep.subr.mxu0 %v1251_v0 }
 0xad1   :  { %1177 = vmatpush3.msra.mxu0 %v1322_v5 }
 0xad2   :  { %1178 = vmatprep.subr.mxu0 %v1251_v0 }
 0xad3   :  { %1179 = vmatpush3.msra.mxu0 %v1330_v6 }
 0xad4   :  { %1180 = vmatprep.subr.mxu0 %v1251_v0 }
 0xad5   :  { %1181 = vmatpush3.msra.mxu0 %v1338_v7 }
 0xb8e   :  { %v666_v41 = vpop.f32.mrf.mxu0 }
 0xb8f   :  { %v670_v42 = vadd.f32 %v666_v41, %v167_v40 }
 0xb90   :  { %v1162_v43 = vpop.f32.mrf.mxu0 }
 0xb91   :  { %1227 = vtanh.f32 %v670_v42  ;;  %v671_v45 = vmul.f32 0.5, %v670_v42 }
 0xb93   :  { %1229 = vtanh.f32 %v671_v45 }
 0xb9e   :  { %v1228_v44 = vpop.eup %1227 }
 0xb9f   :  { %678 = vrot.lane.b32.xlu1 %v1228_v44, %s1253_s20 }
 0xba0   :  { %v1230_v46 = vpop.eup %1229 }
 0xba1   :  { %v673_v47 = vadd.f32 1.0, %v1230_v46  ;;  %v13_v46 = vstv %s1526_s7 }
 0xba2   :  { %14 = vst [vmem:[#allocation3] sm:$0x1] %v13_v46 }
 0xba3   :  { %v674_v48 = vmul.f32 0.5, %v673_v47 }
 0xba5   :  { %v676_v51 = vmul.f32 %v674_v48, %v587_v35 }
 0xc11   :  { %v679_v49 = vpop.permute.xlu1 %678 }
 0xc12   :  { %v681_v50 = vmul.f32 %v679_v49, %v674_v48 }
 0xc14   :  { %683 = vrot.lane.b32.xlu0 %v681_v50, %s1253_s20 }
 0xc86   :  { %v684_v52 = vpop.permute.xlu0 %683 }
 0xc87   :  { %v686_v53 = vadd.f32 %v684_v52, %v676_v51 }
 0xc89   :  { %1231 = vtanh.f32 %v686_v53 }
 0xc96   :  { %v1232_v54 = vpop.eup %1231 }
 0xc97   :  { %689 = vrot.lane.b32.xlu1 %v1232_v54, %s1253_s20  ;;  %v1044_v54 = vld [vmem:[#allocation3] ss:$0 sm:$0xff] }
 0xd09   :  { %v690_v55 = vpop.permute.xlu1 %689 }
 0xd0a   :  { %v692_v56 = vmul.f32 %v690_v55, %v674_v48 }
 0xd0c   :  { %695 = vrot.lane.b32.xlu0 %v692_v56, %s1254_s2 }
 0xd7e   :  { %v696_v57 = vpop.permute.xlu0 %695 }
 0xd7f   :  { %1172 = vmatmul.mubr.msk.f32.vlgmr.msra.gmra.mxu1 %vm196_vm3, %v696_v57 }
 0xd80   :  { %1186 = vmatpush3.msra.mxu1 %v1308_v2  ;;  %1193 = vmatprep.mubr.msk.f32.mxu1 %vm1252_vm2, %v1251_v0 }
 0xd81   :  { %1187 = vmatprep.subr.mxu1 %v1251_v0 }
 0xd82   :  { %1188 = vmatpush3.msra.mxu1 %v1322_v5 }
 0xd83   :  { %1189 = vmatprep.subr.mxu1 %v1251_v0 }
 0xd84   :  { %1190 = vmatpush3.msra.mxu1 %v1330_v6 }
 0xd85   :  { %1191 = vmatprep.subr.mxu1 %v1251_v0 }
 0xd86   :  { %1192 = vmatpush3.msra.mxu1 %v1338_v7 }
 0xe3f   :  { %v765_v62 = vpop.f32.mrf.mxu1 }
 0xe40   :  { %v769_v2 = vadd.f32 %v765_v62, %v172_v59 }
 0xe41   :  { %v1173_v63 = vpop.f32.mrf.mxu1 }
 0xe42   :  { %1233 = vtanh.f32 %v769_v2  ;;  %v770_v3 = vmul.f32 0.5, %v769_v2 }
 0xe44   :  { %1235 = vtanh.f32 %v770_v3 }
 0xe4f   :  { %v1234_v1 = vpop.eup %1233 }
 0xe50   :  { %777 = vrot.lane.b32.xlu1 %v1234_v1, %s1253_s20 }
 0xe51   :  { %v1236_v5 = vpop.eup %1235 }
 0xe52   :  { %v772_v4 = vadd.f32 1.0, %v1236_v5 }
 0xe54   :  { %v773_v8 = vmul.f32 0.5, %v772_v4 }
 0xe56   :  { %v775_v0 = vmul.f32 %v773_v8, %v686_v53  ;;  %v1255_v53 = vmov 0  }
 0xe57   :  { %1201 = vset.pattern.permute.xlu1 %v1255_v53  ;;  %1202 = vset.pattern.permute.xlu0 %v1255_v53 }
 0xec2   :  { %v778_v6 = vpop.permute.xlu1 %777 }
 0xec3   :  { %v780_v9 = vmul.f32 %v778_v6, %v773_v8 }
 0xec5   :  { %782 = vrot.lane.b32.xlu0 %v780_v9, %s1253_s20 }
 0xf37   :  { %v783_v7 = vpop.permute.xlu0 %782 }
 0xf38   :  { %v785_v11 = vadd.f32 %v783_v7, %v775_v0 }
 0xf3a   :  { %1237 = vtanh.f32 %v785_v11 }
 0xf47   :  { %v1238_v58 = vpop.eup %1237 }
 0xf48   :  { %788 = vrot.lane.b32.xlu1 %v1238_v58, %s1253_s20 }
 0xfba   :  { %v789_v12 = vpop.permute.xlu1 %788 }
 0xfbb   :  { %v791_v13 = vmul.f32 %v789_v12, %v773_v8 }
 0xfbd   :  { %794 = vrot.lane.b32.xlu0 %v791_v13, %s1254_s2 }
0x102f   :  { %v795_v14 = vpop.permute.xlu0 %794 }
0x1030   :  { %1183 = vmatmul.mubr.msk.f32.vlgmr.msra.gmra.mxu0 %vm196_vm3, %v795_v14 }
0x10f0   :  { %v864_v16 = vpop.f32.mrf.mxu0 }
0x10f1   :  { %v868_v17 = vadd.f32 %v864_v16, %v177_v15 }
0x10f2   :  { %v1184_v18 = vpop.f32.mrf.mxu0 }
0x10f3   :  { %1239 = vtanh.f32 %v868_v17  ;;  %v869_v20 = vmul.f32 0.5, %v868_v17 }
0x10f5   :  { %1241 = vtanh.f32 %v869_v20 }
0x1100   :  { %v1240_v19 = vpop.eup %1239 }
0x1101   :  { %876 = vrot.lane.b32.xlu1 %v1240_v19, %s1253_s20 }
0x1102   :  { %v1242_v21 = vpop.eup %1241 }
0x1103   :  { %v871_v22 = vadd.f32 1.0, %v1242_v21 }
0x1105   :  { %v872_v23 = vmul.f32 0.5, %v871_v22 }
0x1107   :  { %v874_v26 = vmul.f32 %v872_v23, %v785_v11 }
0x1173   :  { %v877_v24 = vpop.permute.xlu1 %876 }
0x1174   :  { %v879_v25 = vmul.f32 %v877_v24, %v872_v23 }
0x1176   :  { %881 = vrot.lane.b32.xlu0 %v879_v25, %s1253_s20 }
0x11e8   :  { %v882_v27 = vpop.permute.xlu0 %881 }
0x11e9   :  { %v884_v28 = vadd.f32 %v882_v27, %v874_v26 }
0x11eb   :  { %1243 = vtanh.f32 %v884_v28 }
0x11f8   :  { %v1244_v61 = vpop.eup %1243 }
0x11f9   :  { %887 = vrot.lane.b32.xlu1 %v1244_v61, %s1253_s20 }
0x126b   :  { %v888_v29 = vpop.permute.xlu1 %887 }
0x126c   :  { %v890_v30 = vmul.f32 %v888_v29, %v872_v23 }
0x126e   :  { %893 = vrot.lane.b32.xlu0 %v890_v30, %s1254_s2 }
0x12e0   :  { %v894_v31 = vpop.permute.xlu0 %893 }
0x12e1   :  { %1194 = vmatmul.mubr.msk.f32.vlgmr.msra.gmra.mxu1 %vm196_vm3, %v894_v31 }
0x13a1   :  { %v963_v33 = vpop.f32.mrf.mxu1 }
0x13a2   :  { %v967_v34 = vadd.f32 %v963_v33, %v182_v32 }
0x13a3   :  { %v1195_v35 = vpop.f32.mrf.mxu1 }
0x13a4   :  { %1245 = vtanh.f32 %v967_v34  ;;  %v968_v37 = vmul.f32 0.5, %v967_v34 }
0x13a6   :  { %1247 = vtanh.f32 %v968_v37 }
0x13b1   :  { %v1246_v36 = vpop.eup %1245 }
0x13b2   :  { %975 = vrot.lane.b32.xlu1 %v1246_v36, %s1253_s20 }
0x13b3   :  { %v1248_v38 = vpop.eup %1247 }
0x13b4   :  { %v970_v39 = vadd.f32 1.0, %v1248_v38 }
0x13b6   :  { %v971_v40 = vmul.f32 0.5, %v970_v39 }
0x13b8   :  { %v973_v60 = vmul.f32 %v971_v40, %v884_v28 }
0x1424   :  { %v976_v41 = vpop.permute.xlu1 %975 }
0x1425   :  { %v978_v42 = vmul.f32 %v976_v41, %v971_v40 }
0x1427   :  { %980 = vrot.lane.b32.xlu0 %v978_v42, %s1253_s20 }
0x142b   :  { %996 = vrot.lane.b32.xlu0 %v1043_v10, %s1254_s2 }
0x1499   :  { %v981_v43 = vpop.permute.xlu0 %980 }
0x149a   :  { %v983_v44 = vadd.f32 %v981_v43, %v973_v60 }
0x149c   :  { %1249 = vtanh.f32 %v983_v44 }
0x149d   :  { %v997_v48 = vpop.permute.xlu0 %996 }
0x14a9   :  { %v1250_v45 = vpop.eup %1249 }
0x14aa   :  { %986 = vrot.lane.b32.xlu1 %v1250_v45, %s1253_s20 }
0x151c   :  { %v987_v47 = vpop.permute.xlu1 %986 }
0x151d   :  { %v989_v49 = vmul.f32 %v987_v47, %v971_v40 }
0x151f   :  { %v999_v50 = vmul.f32 %v997_v48, %v989_v49 }
0x1521   :  { %1001 = vrot.lane.b32.xlu1 %v999_v50, %s1254_s2 }
0x1593   :  { %v1002_v51 = vpop.permute.xlu1 %1001 }
0x1594   :  { %v1004_v52 = vsel %vm196_vm3, %v1002_v51, 0.0 }
0x1595   :  { %1005 = vadd.xlane.f32.xlu0 %v1004_v52 }
0x161e   :  { %v1006_v55 = vpop.xlane.xlu0 %1005 }
0x161f   :  { %v1014_v56 = vadd.f32 %v1044_v54, %v1006_v55 }
0x1621   :  { %1017 = vperm.xlu1 %1201, %v1014_v56  }
0x169c   :  { %v1018_v57 = vpop.permute.xlu1 %1017 }
0x169d   :  { %1020 = vst [vmem:[%s1527_s8] sm:$0xff] %v1018_v57 }

</bundles_post_ra>
